<compile_context>
chip_gen: v5e
topology: v5e:2x2
jax: 0.10.0
libtpu: 0.0.40
codegen_flags: <defaults>
</compile_context>

<pallas_src>
import math
from functools import lru_cache, partial

import jax
import jax.numpy as jnp
import numpy as np
from jax.experimental import pallas as pl
from jax.experimental.pallas import tpu as pltpu

_LANES = 128
_SUBLANES = 8
_ROW_ALIGN = 32                 # int8/bool packing tile is (32, 128)
_MAX_BLOCK_ROWS = 8192          # 8192 x 128 f32 = 4 MiB per input block
_SINGLE_BLOCK_ROWS = 2048       # <= 1 MiB f32 per input: one block, no grid loop
_MIN_STEPS = 8                  # >= 4 blocks per TensorCore on 2-TC chips (v7x)
_ND_TARGET_ELEMS = 1 << 20      # ~1M padded output elems per block
_MAX_BN = 256 * _LANES          # lane-dim block cap for the N-D path
_VMEM_LIMIT = 32 * 1024 * 1024

_SUPPORTED_OPS = ("Equal", "Less", "LessOrEqual", "Greater", "GreaterOrEqual")

_DTYPE_DOWN = {
    np.dtype(np.float64): jnp.float32,
    np.dtype(np.int64): jnp.int32,
    np.dtype(np.uint64): jnp.uint32,
}


def _cdiv(a, b):
    return -(-a // b)


def _round_up(x, m):
    return _cdiv(x, m) * m


def _common_dtype(a_dtype, b_dtype):
    # NOTE: jnp.promote_types may differ from torch promotion for exotic
    # int/float mixes; identical for same-dtype and standard float/int cases.
    dt = np.dtype(jnp.promote_types(a_dtype, b_dtype))
    return _DTYPE_DOWN.get(dt, dt)          # clamp 64-bit promotions to 32-bit


@lru_cache(maxsize=1)
def _mask_dtype():
    """jnp.bool_ when the backend supports bool VMEM kernel outputs, else int8."""
    def probe(x_ref, o_ref):
        o_ref[...] = x_ref[...] > 0

    try:
        out = pl.pallas_call(
            probe,
            out_shape=jax.ShapeDtypeStruct((_SUBLANES, _LANES), jnp.bool_),
        )(jnp.zeros((_SUBLANES, _LANES), jnp.float32))
        jax.block_until_ready(out)
        return jnp.bool_
    except Exception:
        # TODO(synk): drop this fallback (one extra HBM pass) once bool VMEM
        # outputs are supported on all target TPU generations.
        return jnp.int8


# --------------------------------------------------------------------------
# Kernel body (shared by all paths): load, promote, compare, store mask.
# --------------------------------------------------------------------------
def _compare_kernel(a_ref, b_ref, o_ref, *, operation_type, common_dt,
                    a_scalar=False, b_scalar=False):
    a = (a_ref[0] if a_scalar else a_ref[...]).astype(common_dt)
    b = (b_ref[0] if b_scalar else b_ref[...]).astype(common_dt)
    if operation_type == "Equal":
        res = a == b
    elif operation_type == "Less":
        res = a < b
    elif operation_type == "LessOrEqual":
        res = a <= b
    elif operation_type == "Greater":
        res = a > b
    elif operation_type == "GreaterOrEqual":
        res = a >= b
    else:
        raise ValueError(f"unsupported operation_type: {operation_type}")
    # Broadcast covers size-1 operand blocks; no-op otherwise.
    o_ref[...] = jnp.broadcast_to(res, o_ref.shape).astype(o_ref.dtype)


# --------------------------------------------------------------------------
# Flat (lane-dense) path: equal shapes or one size-1 operand, n % 128 == 0.
# --------------------------------------------------------------------------
def _pick_block_rows(rows):
    """Single full-extent block for small slabs; for big slabs target >=8
    pipeline steps (>=4/TensorCore on 2-TC v7x) with blocks capped at 4 MiB
    per f32 input, multiple of 32 rows for int8/bool output packing."""
    if rows <= _SINGLE_BLOCK_ROWS:
        return rows
    cap = min(_MAX_BLOCK_ROWS,
              max(_SINGLE_BLOCK_ROWS,
                  _round_up(_cdiv(rows, _MIN_STEPS), _ROW_ALIGN)))
    return min(cap, (rows // _ROW_ALIGN) * _ROW_ALIGN)


def _compare_flat(a, b, operation_type, common_dt, out_shape, n, out_dtype):
    rows = n // _LANES
    block_rows = _pick_block_rows(rows)
    grid = (_cdiv(rows, block_rows),)
    dense_spec = pl.BlockSpec((block_rows, _LANES), lambda i: (i, 0))

    def prep(x):
        if x.size == 1:
            if (jnp.issubdtype(common_dt, jnp.floating)
                    or jnp.issubdtype(common_dt, jnp.signedinteger)):
                # Lossless 32-bit SMEM container; kernel casts back to common_dt.
                cont = (jnp.float32 if jnp.issubdtype(common_dt, jnp.floating)
                        else jnp.int32)
                return (x.reshape((1,)).astype(cont),
                        pl.BlockSpec(memory_space=pltpu.MemorySpace.SMEM),
                        True)
            # Unsigned / other exotic dtypes: tiny (1,1) VMEM block instead.
            return x.reshape((1, 1)), pl.BlockSpec((1, 1), lambda i: (0, 0)), False
        return x.reshape(rows, _LANES), dense_spec, False    # free reshape

    a_arg, a_spec, a_sc = prep(a)
    b_arg, b_spec, b_sc = prep(b)

    kernel = partial(_compare_kernel, operation_type=operation_type,
                     common_dt=common_dt, a_scalar=a_sc, b_scalar=b_sc)
    out = pl.pallas_call(
        kernel,
        out_shape=jax.ShapeDtypeStruct((rows, _LANES), out_dtype),
        grid=grid,
        in_specs=[a_spec, b_spec],
        out_specs=dense_spec,
        compiler_params=pltpu.CompilerParams(
            dimension_semantics=("parallel",),
            vmem_limit_bytes=_VMEM_LIMIT),
        cost_estimate=pl.CostEstimate(
            flops=n, transcendentals=0,
            bytes_accessed=int(a.nbytes + b.nbytes + n)),   # 1-byte mask out
    )(a_arg, b_arg)

    out = out.reshape(out_shape)            # free (layout-preserving) reshape
    if out.dtype != np.bool_:
        out = out.astype(jnp.bool_)         # only on the int8 fallback path
    return out


# --------------------------------------------------------------------------
# General broadcast / ragged path: broadcast expressed in BlockSpec index_maps.
# --------------------------------------------------------------------------
def _collapse_dims(out_shape, a_shape, b_shape):
    """Merge adjacent dims whose broadcast pattern matches for both operands.
    All implied reshapes are layout-preserving (free)."""
    new_o, new_a, new_b = [out_shape[0]], [a_shape[0]], [b_shape[0]]
    for d in range(1, len(out_shape)):
        mo = new_o[-1] * out_shape[d]
        ma = new_a[-1] * a_shape[d]
        mb = new_b[-1] * b_shape[d]
        if (ma == 1 or ma == mo) and (mb == 1 or mb == mo):
            new_o[-1], new_a[-1], new_b[-1] = mo, ma, mb
        else:
            new_o.append(out_shape[d])
            new_a.append(a_shape[d])
            new_b.append(b_shape[d])
    return tuple(new_o), tuple(new_a), tuple(new_b)


def _pick_nd_blocks(oshape):
    """One coarse block covering ~1M padded output elems, built from the last
    (lane) dim backwards; last-two block dims are full-extent or (32,128)
    aligned so the BlockSpec tiling constraint always holds."""
    r = len(oshape)
    block = [1] * r
    n_last = oshape[-1]
    block[-1] = n_last if n_last <= _MAX_BN else _MAX_BN
    budget = max(1, _ND_TARGET_ELEMS // _round_up(block[-1], _LANES))
    for d in range(r - 2, -1, -1):
        if budget <= 1:
            break
        dim = oshape[d]
        padded = _round_up(dim, _ROW_ALIGN) if d == r - 2 else dim
        if padded <= budget:
            block[d] = dim
            budget //= padded
        else:
            take = budget
            if d == r - 2:
                take = max(_ROW_ALIGN, (take // _ROW_ALIGN) * _ROW_ALIGN)
            block[d] = min(dim, take)
            budget = 1
    return tuple(block)


def _compare_nd(a, b, operation_type, common_dt, out_shape, out_dtype):
    work = tuple(out_shape) if len(out_shape) > 0 else (1,)
    r0 = len(work)
    a_nd = a.reshape((1,) * (r0 - a.ndim) + tuple(a.shape))
    b_nd = b.reshape((1,) * (r0 - b.ndim) + tuple(b.shape))

    oshape, a_shape, b_shape = _collapse_dims(work, a_nd.shape, b_nd.shape)
    if len(oshape) < 2:                       # keep rank >= 2 for TPU tiling
        oshape = (1,) + oshape
        a_shape = (1,) + a_shape
        b_shape = (1,) + b_shape
    assert len(oshape) >= 2
    a_nd = a_nd.reshape(a_shape)              # free reshapes
    b_nd = b_nd.reshape(b_shape)
    r = len(oshape)

    block = _pick_nd_blocks(oshape)
    grid = tuple(_cdiv(oshape[d], block[d]) for d in range(r))

    def op_spec(op_shape):
        matches = tuple(op_shape[d] == oshape[d] for d in range(r))
        blk = tuple(block[d] if matches[d] else 1 for d in range(r))

        def index_map(*idx, _m=matches):
            return tuple(i if m else 0 for i, m in zip(idx, _m))

        return pl.BlockSpec(blk, index_map)

    n = math.prod(oshape)
    kernel = partial(_compare_kernel, operation_type=operation_type,
                     common_dt=common_dt)
    out = pl.pallas_call(
        kernel,
        out_shape=jax.ShapeDtypeStruct(oshape, out_dtype),
        grid=grid,
        in_specs=[op_spec(a_shape), op_spec(b_shape)],
        out_specs=pl.BlockSpec(block, lambda *idx: idx),
        compiler_params=pltpu.CompilerParams(
            dimension_semantics=("parallel",) * r,
            vmem_limit_bytes=_VMEM_LIMIT),
        cost_estimate=pl.CostEstimate(
            flops=n, transcendentals=0,
            bytes_accessed=int(a.nbytes + b.nbytes + n)),
    )(a_nd, b_nd)

    out = out.reshape(out_shape)
    if out.dtype != np.bool_:
        out = out.astype(jnp.bool_)           # only on the int8 fallback path
    return out


# --------------------------------------------------------------------------
# Public entry point: JAX/Pallas equivalent of OnnxCompare(op)(a, b).
# --------------------------------------------------------------------------
def onnx_compare(a, b, operation_type: str):
    if operation_type not in _SUPPORTED_OPS:
        raise ValueError(f"unsupported operation_type: {operation_type}")

    a = jnp.asarray(a)
    b = jnp.asarray(b)
    # bool operands compare identically as int8 0/1 (avoids bool VMEM inputs).
    if a.dtype == np.bool_:
        a = a.astype(jnp.int8)
    if b.dtype == np.bool_:
        b = b.astype(jnp.int8)
    # TPU VPU compares are <=32-bit: clamp any 64-bit operand (x64 mode only).
    if a.dtype in _DTYPE_DOWN:
        a = a.astype(_DTYPE_DOWN[a.dtype])
    if b.dtype in _DTYPE_DOWN:
        b = b.astype(_DTYPE_DOWN[b.dtype])

    out_shape = jnp.broadcast_shapes(a.shape, b.shape)
    n = math.prod(out_shape)
    if n == 0:
        return jnp.zeros(out_shape, jnp.bool_)

    common_dt = _common_dtype(a.dtype, b.dtype)
    out_dtype = _mask_dtype()

    if (a.shape == b.shape or a.size == 1 or b.size == 1) and n % _LANES == 0:
        return _compare_flat(a, b, operation_type, common_dt, out_shape, n,
                             out_dtype)
    return _compare_nd(a, b, operation_type, common_dt, out_shape, out_dtype)


if __name__ == "__main__":
    key = jax.random.PRNGKey(0)
    ka, kb, kc = jax.random.split(key, 3)

    # General-broadcast case: a is NCHW-like, b broadcasts over N and H.
    a = jax.random.normal(ka, (2, 4, 16, 16), dtype=jnp.float32)
    b = jax.random.normal(kb, (1, 4, 1, 16), dtype=jnp.float32)
    a = a.at[0, 0, 0, :].set(b[0, 0, 0, :])   # force exact equalities

    c = jax.random.normal(kc, (2, 4, 16, 16), dtype=jnp.float32)  # equal-shape
    s = jnp.float32(0.1)                                          # scalar

    ref_fns = {
        "Equal": lambda x, y: x == y,
        "Less": lambda x, y: x < y,
        "LessOrEqual": lambda x, y: x <= y,
        "Greater": lambda x, y: x > y,
        "GreaterOrEqual": lambda x, y: x >= y,
    }

    cases = {
        "Equal": [(a, b), (a, c), (a, s)],
        "Less": [(a, b), (a, c)],
        "LessOrEqual": [(a, b)],
        "Greater": [(a, b)],
        "GreaterOrEqual": [(a, b), (a, s)],
    }

    ok = True
    for op, pairs in cases.items():
        ref_fn = ref_fns[op]
        for x, y in pairs:
            out = onnx_compare(x, y, op)
            jax.block_until_ready(out)
            ref = ref_fn(x, y)
            if out.shape != ref.shape or out.dtype != np.bool_:
                ok = False
            elif not bool(jnp.all(out == ref)):
                ok = False

    print("KERNEL_OK" if ok else "KERNEL_MISMATCH")
</pallas_src>

<mosaic_0001>
module attributes {stable_mosaic.version = 11 : i64} {
  func.func @probe(%arg0: memref<8x128xf32, #tpu.memory_space<vmem>>, %arg1: memref<8x128xi32, #tpu.memory_space<vmem>>) attributes {dimension_semantics = [], scalar_prefetch = 0 : i64, scratch_operands = 0 : i64, tpu.core_type = #tpu.core_type<tc>} {
    %c0 = arith.constant 0 : index
    %c0_0 = arith.constant 0 : index
    %0 = vector.load %arg0[%c0, %c0_0] : memref<8x128xf32, #tpu.memory_space<vmem>>, vector<8x128xf32>
    %cst = arith.constant 0.000000e+00 : f32
    %1 = vector.broadcast %cst : f32 to vector<8x128xf32>
    %2 = arith.cmpf ogt, %0, %1 : vector<8x128xf32>
    %c0_1 = arith.constant 0 : index
    %c0_2 = arith.constant 0 : index
    %3 = vector.load %arg1[%c0_1, %c0_2] : memref<8x128xi32, #tpu.memory_space<vmem>>, vector<8x128xi32>
    %4 = arith.extui %2 : vector<8x128xi1> to vector<8x128xi32>
    %cst_3 = arith.constant dense<0> : vector<8x128xi32>
    %5 = arith.cmpi ne, %3, %cst_3 : vector<8x128xi32>
    tpu.vector_store %arg1[%c0_1, %c0_2], %4 {strides = array<i32>} : memref<8x128xi32, #tpu.memory_space<vmem>>, vector<8x128xi32>,
    return
  }
}

module attributes {stable_mosaic.version = 11 : i64} {
  func.func @_compare_kernel(%arg0: i32, %arg1: i32, %arg2: i32, %arg3: i32, %arg4: memref<2x4x16x16xf32, #tpu.memory_space<vmem>>, %arg5: memref<1x4x1x16xf32, #tpu.memory_space<vmem>>, %arg6: memref<2x4x16x16xi8, #tpu.memory_space<vmem>>) attributes {dimension_semantics = [#tpu.dimension_semantics<parallel>, #tpu.dimension_semantics<parallel>, #tpu.dimension_semantics<parallel>, #tpu.dimension_semantics<parallel>], iteration_bounds = array<i64: 1, 1, 1, 1>, scalar_prefetch = 0 : i64, scratch_operands = 0 : i64, tpu.core_type = #tpu.core_type<tc>, window_params = [{transform_indices = @transform_0, window_bounds = array<i64: 2, 4, 16, 16>}, {transform_indices = @transform_1, window_bounds = array<i64: 1, 4, 1, 16>}, {transform_indices = @transform_2, window_bounds = array<i64: 2, 4, 16, 16>}]} {
    %c0 = arith.constant 0 : index
    %c0_0 = arith.constant 0 : index
    %c0_1 = arith.constant 0 : index
    %c0_2 = arith.constant 0 : index
    %0 = vector.load %arg4[%c0, %c0_0, %c0_1, %c0_2] : memref<2x4x16x16xf32, #tpu.memory_space<vmem>>, vector<2x4x16x16xf32>
    %c0_3 = arith.constant 0 : index
    %c0_4 = arith.constant 0 : index
    %c0_5 = arith.constant 0 : index
    %c0_6 = arith.constant 0 : index
    %1 = vector.load %arg5[%c0_3, %c0_4, %c0_5, %c0_6] : memref<1x4x1x16xf32, #tpu.memory_space<vmem>>, vector<1x4x1x16xf32>
    %2 = vector.broadcast %1 : vector<1x4x1x16xf32> to vector<2x4x16x16xf32>
    %3 = arith.cmpf oeq, %0, %2 : vector<2x4x16x16xf32>
    %4 = arith.extui %3 : vector<2x4x16x16xi1> to vector<2x4x16x16xi8>
    %c0_7 = arith.constant 0 : index
    %c0_8 = arith.constant 0 : index
    %c0_9 = arith.constant 0 : index
    %c0_10 = arith.constant 0 : index
    %5 = vector.load %arg6[%c0_7, %c0_8, %c0_9, %c0_10] : memref<2x4x16x16xi8, #tpu.memory_space<vmem>>, vector<2x4x16x16xi8>
    tpu.vector_store %arg6[%c0_7, %c0_8, %c0_9, %c0_10], %4 {strides = array<i32>} : memref<2x4x16x16xi8, #tpu.memory_space<vmem>>, vector<2x4x16x16xi8>,
    return
  }
  func.func @transform_0(%arg0: i32, %arg1: i32, %arg2: i32, %arg3: i32) -> (i32, i32, i32, i32) {
    %c0_i32 = arith.constant 0 : i32
    return %arg0, %arg1, %arg2, %arg3 : i32, i32, i32, i32
  }
  func.func @transform_1(%arg0: i32, %arg1: i32, %arg2: i32, %arg3: i32) -> (i32, i32, i32, i32) {
    %c0_i32 = arith.constant 0 : i32
    %c0_i32_0 = arith.constant 0 : i32
    %c0_i32_1 = arith.constant 0 : i32
    return %c0_i32, %arg1, %c0_i32_0, %arg3 : i32, i32, i32, i32
  }
  func.func @transform_2(%arg0: i32, %arg1: i32, %arg2: i32, %arg3: i32) -> (i32, i32, i32, i32) {
    %c0_i32 = arith.constant 0 : i32
    return %arg0, %arg1, %arg2, %arg3 : i32, i32, i32, i32
  }
}

</mosaic_0001>

<bundles_post_ra>
// kernel: tpu_custom_call.1
= control target key start
LH: loop header
LB: loop body
LE: loop exit
PB: predicated region body
PF: predicated region fallthrough
CT: control target
= control target key end

     0   :  { %6 = vsyncpa [#allocation3], 0  ;;  %s59_s9 = smov [#allocation2]   ;;  %s77_s0 = inlined_call_operand.hbm [shape: f32[8,128], index: 0, kind: input, shape index: {}]   ;;  %s78_s1 = inlined_call_operand.vmem [shape: s32[8,128], index: 1, kind: output, shape index: {}]  }
   0x1   :  { %s12_s8 = sshll.u32 %s77_s0, 4  ;;  %s14_s10 = sshll.u32 %s59_s9, 4  ;;  %s13_s8 = int_to_ptr.hbm [resolvable:$true] %s12_s8  ;;  %s15_s10 = int_to_ptr.vmem [resolvable:$true] %s14_s10 }
   0x2   :  { %17 = dma.hbm_to_vmem [thread:$0]  %s13_s8, 128, %s15_s10, [#allocation3]  }
   0x3   :  { %57 = dma.done.wait [#allocation3], 128  }
   0x4   :  { %58 = vsyncadd [#allocation3], 4294967168  ;;  %v22_v0 = vld [vmem:[#allocation2] sm:$0xff]  ;;  %v60_v1 = vmov 0  }
   0x5   :  { %vm23_vm0 = vcmp.gt.f32.partialorder %v22_v0, 0.0 }
   0x6   :  { %v24_v2 = vsel %vm23_vm0, 1, %v60_v1 }
   0x7   :  { %25 = vst [vmem:[%s78_s1] sm:$0xff] %v24_v2 }
   0x8   :  { %30 = vsyncpa [#allocation3], 1 }

// kernel: tpu_custom_call.1
= control target key start
LH: loop header
LB: loop body
LE: loop exit
PB: predicated region body
PF: predicated region fallthrough
CT: control target
= control target key end

     0   :  { %7 = vsyncpa [#allocation3], 0  ;;  %s405_s0 = inlined_call_operand.hbm [shape: f32[2,4,16,16], index: 0, kind: input, shape index: {}]   ;;  %s406_s1 = inlined_call_operand.hbm [shape: f32[1,4,1,16], index: 1, kind: input, shape index: {}]   ;;  %s407_s2 = inlined_call_operand.hbm [shape: s8[2,4,16,16], index: 2, kind: output, shape index: {}]  }
   0x1   :  { %8 = vsyncpa [#allocation6], 0 }
   0x2   :  { %9 = vsyncpa [#allocation4], 0  ;;  %s14_s11 = sshll.u32 %s405_s0, 4  ;;  %s319_s12 = smov [#allocation2]   ;;  %s15_s11 = int_to_ptr.hbm [resolvable:$true] %s14_s11 }
   0x3   :  { %s16_s13 = sshll.u32 %s319_s12, 4  ;;  %s27_s16 = sshll.u32 %s406_s1, 4  ;;  %s17_s13 = int_to_ptr.vmem [resolvable:$true] %s16_s13  ;;  %s28_s16 = int_to_ptr.hbm [resolvable:$true] %s27_s16 }
   0x4   :  { %s320_s17 = smov 128   ;;  %s321_s18 = smov 8  }
   0x5   :  { %22 = dma.hbm_to_vmem [thread:$0]  %s15_s11, 2048, %s17_s13, [#allocation3], %s320_s17, %s320_s17, %s321_s18  }
   0x6   :  { %s322_s19 = smov [#allocation5]   ;;  %s323_s21 = smov 16  }
   0x7   :  { %s29_s20 = sshll.u32 %s322_s19, 4  ;;  %s324_s22 = smov 1   ;;  %s30_s20 = int_to_ptr.vmem [resolvable:$true] %s29_s20 }
   0x8   :  { %35 = dma.hbm_to_vmem [thread:$0]  %s28_s16, 64, %s30_s20, [#allocation6], %s323_s21, %s323_s21, %s324_s22  }
   0x9   :  { %313 = dma.done.wait [#allocation3], 2048  }
   0xa   :  { %314 = vsyncadd [#allocation3], 4294965248 }
   0xb   :  { %315 = dma.done.wait [#allocation6], 64  }
   0xc   :  { %316 = vsyncadd [#allocation6], 4294967232  ;;  %v46_v0 = vld [vmem:[#allocation2] sm:$0xff]  ;;  %v47_v1 = vld [vmem:[#allocation2 + $0x8] sm:$0xff]  ;;  %v325_v11 = vmov 0   ;;  %vm190_vm8 = vcmask 123904  }
   0xd   :  { %v237_v2 = vld [vmem:[#allocation5] ss:$0 sm:$0xff]  ;;  %v48_v3 = vld [vmem:[#allocation2 + $0x10] sm:$0xff]  ;;  %v49_v4 = vld [vmem:[#allocation2 + $0x18] sm:$0xff]  ;;  %s326_s0 = smov [#allocation7]   ;;  %s213_s25 = sshll.u32 %s407_s2, 4  ;;  %s214_s25 = int_to_ptr.hbm [resolvable:$true] %s213_s25 }
   0xe   :  { %v350_v5 = vld [vmem:[#allocation5 + $0x1] ss:$0 sm:$0xff]  ;;  %vm78_vm0 = vcmp.eq.f32.partialorder %v46_v0, %v237_v2  ;;  %vm79_vm1 = vcmp.eq.f32.partialorder %v47_v1, %v237_v2  ;;  %v51_v7 = vld [vmem:[#allocation2 + $0x28] sm:$0xff]  ;;  %v352_v8 = vld [vmem:[#allocation5 + $0x2] ss:$0 sm:$0xff]  ;;  %s211_s1 = sshll.u32 %s326_s0, 4  ;;  %s212_s1 = int_to_ptr.vmem [resolvable:$true] %s211_s1 }
   0xf   :  { %v50_v6 = vld [vmem:[#allocation2 + $0x20] sm:$0xff]  ;;  %vm94_vm2 = vmpackc.low %vm79_vm1, %vm78_vm0  ;;  %vm80_vm3 = vcmp.eq.f32.partialorder %v48_v3, %v350_v5  ;;  %vm81_vm4 = vcmp.eq.f32.partialorder %v49_v4, %v350_v5  ;;  %v52_v9 = vld [vmem:[#allocation2 + $0x30] sm:$0xff]  ;;  %vm83_vm7 = vcmp.eq.f32.partialorder %v51_v7, %v352_v8  ;;  %s327_s26 = smov 32   ;;  %s328_s27 = smov 2  }
  0x10   :  { %v53_v10 = vld [vmem:[#allocation2 + $0x38] sm:$0xff]  ;;  %v95_v12 = vsel %vm94_vm2, 16711935, %v325_v11  ;;  %vm99_vm5 = vmpackc.low %vm81_vm4, %vm80_vm3  ;;  %vm82_vm6 = vcmp.eq.f32.partialorder %v50_v6, %v352_v8  ;;  %v359_v13 = vld [vmem:[#allocation5 + $0x3] ss:$0 sm:$0xff] }
  0x11   :  { %v97_v14 = vpack.c.b8 %v95_v12, %v95_v12  ;;  %v100_v15 = vsel %vm99_vm5, 16711935, %v325_v11  ;;  %vm104_vm9 = vmpackc.low %vm83_vm7, %vm82_vm6  ;;  %v54_v16 = vld [vmem:[#allocation2 + $0x40] sm:$0xff]  ;;  %v55_v17 = vld [vmem:[#allocation2 + $0x48] sm:$0xff]  ;;  %vm84_vm10 = vcmp.eq.f32.partialorder %v52_v9, %v359_v13  ;;  %vm85_vm11 = vcmp.eq.f32.partialorder %v53_v10, %v359_v13 }
  0x12   :  { %v102_v18 = vpack.c.b8 %v100_v15, %v100_v15  ;;  %v105_v19 = vsel %vm104_vm9, 16711935, %v325_v11  ;;  %v56_v20 = vld [vmem:[#allocation2 + $0x50] sm:$0xff]  ;;  %vm109_vm13 = vmpackc.low %vm85_vm11, %vm84_vm10  ;;  %vm86_vm14 = vcmp.eq.f32.partialorder %v54_v16, %v237_v2  ;;  %vm87_vm15 = vcmp.eq.f32.partialorder %v55_v17, %v237_v2  ;;  %v57_v42 = vld [vmem:[#allocation2 + $0x58] sm:$0xff] }
  0x13   :  { %vm98_vm12 = vnez %v97_v14  ;;  %v107_v21 = vpack.c.b8 %v105_v19, %v105_v19  ;;  %v110_v23 = vsel %vm109_vm13, 16711935, %v325_v11  ;;  %vm88_vm1 = vcmp.eq.f32.partialorder %v56_v20, %v350_v5  ;;  %vm114_vm3 = vmpackc.low %vm87_vm15, %vm86_vm14  ;;  %v58_v43 = vld [vmem:[#allocation2 + $0x60] sm:$0xff]  ;;  %v59_v44 = vld [vmem:[#allocation2 + $0x68] sm:$0xff] }
  0x14   :  { %v134_v22 = vsel %vm98_vm12, 16843009, %v325_v11  ;;  %vm103_vm0 = vnez %v102_v18  ;;  %v112_v30 = vpack.c.b8 %v110_v23, %v110_v23  ;;  %v115_v37 = vsel %vm114_vm3, 16711935, %v325_v11  ;;  %v60_v49 = vld [vmem:[#allocation2 + $0x70] sm:$0xff]  ;;  %v61_v54 = vld [vmem:[#allocation2 + $0x78] sm:$0xff] }
  0x15   :  { %v142_v24 = vunpack.c.0.s8 %v134_v22  ;;  %v143_v25 = vunpack.c.1.s8 %v134_v22  ;;  %v135_v26 = vsel %vm103_vm0, 16843009, %v325_v11  ;;  %vm108_vm2 = vnez %v107_v21 }
  0x16   :  { %v144_v27 = vunpack.c.0.s8 %v135_v26  ;;  %v145_v28 = vunpack.c.1.s8 %v135_v26  ;;  %v136_v29 = vsel %vm108_vm2, 16843009, %v325_v11  ;;  %vm113_vm4 = vnez %v112_v30 }
  0x17   :  { %v158_v31 = vpack.c.b16 %v142_v24, %v142_v24  ;;  %v160_v32 = vpack.c.b16 %v143_v25, %v143_v25  ;;  %v146_v33 = vunpack.c.0.s8 %v136_v29  ;;  %v147_v34 = vunpack.c.1.s8 %v136_v29 }
  0x18   :  { %v162_v35 = vpack.c.b16 %v144_v27, %v144_v27  ;;  %v164_v36 = vpack.c.b16 %v145_v28, %v145_v28  ;;  %v137_v47 = vsel %vm113_vm4, 16843009, %v325_v11  ;;  %v117_v48 = vpack.c.b8 %v115_v37, %v115_v37 }
  0x19   :  { %v159_v38 = vpack.c.b8 %v158_v31, %v158_v31  ;;  %v161_v39 = vpack.c.b8 %v160_v32, %v160_v32  ;;  %v166_v40 = vpack.c.b16 %v146_v33, %v146_v33  ;;  %v168_v41 = vpack.c.b16 %v147_v34, %v147_v34 }
  0x1a   :  { %v163_v45 = vpack.c.b8 %v162_v35, %v162_v35  ;;  %v165_v46 = vpack.c.b8 %v164_v36, %v164_v36  ;;  %v148_v52 = vunpack.c.0.s8 %v137_v47  ;;  %v149_v53 = vunpack.c.1.s8 %v137_v47 }
  0x1b   :  { %191 = vst.msk [vmem:[#allocation7] sm:$0x3] %vm190_vm8, %v159_v38  ;;  %v167_v50 = vpack.c.b8 %v166_v40, %v166_v40  ;;  %v169_v51 = vpack.c.b8 %v168_v41, %v168_v41  ;;  %vm118_vm5 = vnez %v117_v48  ;;  %vm89_vm6 = vcmp.eq.f32.partialorder %v57_v42, %v350_v5 }
  0x1c   :  { %192 = vst.msk [vmem:[#allocation7 + $0x2] sm:$0x3] %vm190_vm8, %v161_v39  ;;  %vm90_vm7 = vcmp.eq.f32.partialorder %v58_v43, %v352_v8  ;;  %vm91_vm9 = vcmp.eq.f32.partialorder %v59_v44, %v352_v8  ;;  %v170_v55 = vpack.c.b16 %v148_v52, %v148_v52  ;;  %v172_v56 = vpack.c.b16 %v149_v53, %v149_v53  ;;  %vm119_vm10 = vmpackc.low %vm89_vm6, %vm88_vm1 }
  0x1d   :  { %193 = vst.msk [vmem:[#allocation7 + $0x4] sm:$0x3] %vm190_vm8, %v163_v45  ;;  %v138_v57 = vsel %vm118_vm5, 16843009, %v325_v11  ;;  %vm92_vm11 = vcmp.eq.f32.partialorder %v60_v49, %v359_v13  ;;  %v120_v60 = vsel %vm119_vm10, 16711935, %v325_v11  ;;  %vm124_vm12 = vmpackc.low %vm91_vm9, %vm90_vm7  ;;  %vm93_vm13 = vcmp.eq.f32.partialorder %v61_v54, %v359_v13 }
  0x1e   :  { %194 = vst.msk [vmem:[#allocation7 + $0x6] sm:$0x3] %vm190_vm8, %v165_v46  ;;  %v150_v58 = vunpack.c.0.s8 %v138_v57  ;;  %v151_v59 = vunpack.c.1.s8 %v138_v57  ;;  %v171_v61 = vpack.c.b8 %v170_v55, %v170_v55  ;;  %v173_v62 = vpack.c.b8 %v172_v56, %v172_v56  ;;  %vm129_vm14 = vmpackc.low %vm93_vm13, %vm92_vm11 }
  0x1f   :  { %195 = vst.msk [vmem:[#allocation7 + $0x8] sm:$0x3] %vm190_vm8, %v167_v50  ;;  %v122_v63 = vpack.c.b8 %v120_v60, %v120_v60  ;;  %v125_v0 = vsel %vm124_vm12, 16711935, %v325_v11  ;;  %v130_v4 = vsel %vm129_vm14, 16711935, %v325_v11 }
  0x20   :  { %196 = vst.msk [vmem:[#allocation7 + $0xa] sm:$0x3] %vm190_vm8, %v169_v51  ;;  %v174_v1 = vpack.c.b16 %v150_v58, %v150_v58  ;;  %v176_v2 = vpack.c.b16 %v151_v59, %v151_v59  ;;  %v127_v3 = vpack.c.b8 %v125_v0, %v125_v0  ;;  %v132_v5 = vpack.c.b8 %v130_v4, %v130_v4 }
  0x21   :  { %197 = vst.msk [vmem:[#allocation7 + $0xc] sm:$0x3] %vm190_vm8, %v171_v61  ;;  %vm123_vm15 = vnez %v122_v63 }
  0x22   :  { %198 = vst.msk [vmem:[#allocation7 + $0xe] sm:$0x3] %vm190_vm8, %v173_v62  ;;  %v175_v6 = vpack.c.b8 %v174_v1, %v174_v1  ;;  %v177_v7 = vpack.c.b8 %v176_v2, %v176_v2  ;;  %v139_v8 = vsel %vm123_vm15, 16843009, %v325_v11  ;;  %vm128_vm0 = vnez %v127_v3 }
  0x23   :  { %v152_v9 = vunpack.c.0.s8 %v139_v8  ;;  %v153_v10 = vunpack.c.1.s8 %v139_v8  ;;  %v140_v12 = vsel %vm128_vm0, 16843009, %v325_v11  ;;  %vm133_vm1 = vnez %v132_v5 }
  0x24   :  { %199 = vst.msk [vmem:[#allocation7 + $0x10] sm:$0x3] %vm190_vm8, %v175_v6  ;;  %v154_v13 = vunpack.c.0.s8 %v140_v12  ;;  %v155_v14 = vunpack.c.1.s8 %v140_v12  ;;  %v141_v15 = vsel %vm133_vm1, 16843009, %v325_v11 }
  0x25   :  { %200 = vst.msk [vmem:[#allocation7 + $0x12] sm:$0x3] %vm190_vm8, %v177_v7  ;;  %v178_v16 = vpack.c.b16 %v152_v9, %v152_v9  ;;  %v180_v17 = vpack.c.b16 %v153_v10, %v153_v10  ;;  %v156_v18 = vunpack.c.0.s8 %v141_v15  ;;  %v157_v19 = vunpack.c.1.s8 %v141_v15 }
  0x26   :  { %v182_v20 = vpack.c.b16 %v154_v13, %v154_v13  ;;  %v184_v21 = vpack.c.b16 %v155_v14, %v155_v14 }
  0x27   :  { %v179_v22 = vpack.c.b8 %v178_v16, %v178_v16  ;;  %v181_v23 = vpack.c.b8 %v180_v17, %v180_v17  ;;  %v186_v24 = vpack.c.b16 %v156_v18, %v156_v18  ;;  %v188_v25 = vpack.c.b16 %v157_v19, %v157_v19 }
  0x28   :  { %v183_v26 = vpack.c.b8 %v182_v20, %v182_v20  ;;  %v185_v27 = vpack.c.b8 %v184_v21, %v184_v21 }
  0x29   :  { %201 = vst.msk [vmem:[#allocation7 + $0x14] sm:$0x3] %vm190_vm8, %v179_v22  ;;  %v187_v11 = vpack.c.b8 %v186_v24, %v186_v24  ;;  %v189_v28 = vpack.c.b8 %v188_v25, %v188_v25 }
  0x2a   :  { %202 = vst.msk [vmem:[#allocation7 + $0x16] sm:$0x3] %vm190_vm8, %v181_v23 }
  0x2b   :  { %203 = vst.msk [vmem:[#allocation7 + $0x18] sm:$0x3] %vm190_vm8, %v183_v26 }
  0x2c   :  { %204 = vst.msk [vmem:[#allocation7 + $0x1a] sm:$0x3] %vm190_vm8, %v185_v27 }
  0x2d   :  { %205 = vst.msk [vmem:[#allocation7 + $0x1c] sm:$0x3] %vm190_vm8, %v187_v11 }
  0x2e   :  { %206 = vst.msk [vmem:[#allocation7 + $0x1e] sm:$0x3] %vm190_vm8, %v189_v28 }
  0x2f   :  { %219 = dma.vmem_to_hbm [thread:$0]  %s212_s1, 512, %s214_s25, [#allocation4], %s327_s26, %s327_s26, %s328_s27  }
  0x30   :  { %317 = dma.done.wait [#allocation4], 512  }
  0x31   :  { %318 = vsyncadd [#allocation4], 4294966784 }
  0x32   :  { %224 = vsyncpa [#allocation3], 1 }
  0x33   :  { %225 = vsyncpa [#allocation6], 1 }
  0x34   :  { %226 = vsyncpa [#allocation4], 1 }

</bundles_post_ra>
